<compile_context>
chip_gen: v6e
topology: v6e:2x2x1
jax: 0.10.0
libtpu: 0.0.40
codegen_flags: <defaults>
</compile_context>

<pallas_src>
import jax
import jax.numpy as jnp
import numpy as np
from jax.experimental import pallas as pl
from jax.experimental.pallas import tpu as pltpu


# ---------------------------------------------------------------------------
# Host-side construction of the fused rfft/truncate/irfft operator.
# ---------------------------------------------------------------------------
def _fourier_matrix(in_len, freq_num, out_len, out_len_padded,
                    dtype=jnp.bfloat16):
    """Real (out_len_padded, in_len) matrix M such that
       (M @ x)[:out_len] == irfft(rfft(x)[:freq_num], n=out_len)
    for any real vector x of length in_len (torch.fft conventions).
    Rows >= out_len are zero padding (sliced off by the wrapper)."""
    eye = np.eye(in_len, dtype=np.float64)
    spec = np.fft.rfft(eye, axis=0)[:freq_num]           # (freq_num, in_len)
    m = np.fft.irfft(spec, n=out_len, axis=0)             # (out_len, in_len)
    if out_len_padded > out_len:
        m = np.pad(m, ((0, out_len_padded - out_len), (0, 0)))
    return jnp.asarray(m, dtype=dtype)


def _round_up(x, m):
    return (x + m - 1) // m * m


_BLOCK_BUDGET_BYTES = 20 * 1024 * 1024     # double-buffered block budget
_VMEM_LIMIT_BYTES = 32 * 1024 * 1024       # safe on v5e/v6e/v7x


def _choose_tn(n, l, out_len_p, x_bytes, o_bytes):
    """Lane-tile for the folded (batch-into-lanes) path; multiple of 128."""
    n_ceil = max(128, _round_up(n, 128))
    for cand in (512, 384, 256, 128):
        if cand > n_ceil:
            continue
        if 2 * cand * (l * x_bytes + out_len_p * o_bytes) <= _BLOCK_BUDGET_BYTES:
            return cand
    return 128


def _choose_tb(b, l, out_len_p, td, x_bytes, o_bytes):
    """Batch-tile for the large-D path."""
    for tb in (8, 4, 2, 1):
        if b % tb:
            continue
        if 2 * tb * td * (l * x_bytes + out_len_p * o_bytes) <= _BLOCK_BUDGET_BYTES:
            return tb
    return 1


# ---------------------------------------------------------------------------
# Kernels
# ---------------------------------------------------------------------------
def _nfl_folded_kernel(m_ref, x_ref, o_ref):
    # m_ref: (out_len_p, L) bf16  -- fused FFT operator, grid-invariant
    # x_ref: (L, TN)       bf16  -- one lane-tile of the (L, B*D) fold
    # o_ref: (out_len_p, TN)     -- lane-dense output tile
    o_ref[...] = jnp.dot(
        m_ref[...], x_ref[...],
        preferred_element_type=jnp.float32,
    ).astype(o_ref.dtype)


def _nfl_batched_kernel(m_ref, x_ref, o_ref):
    # m_ref: (out_len_p, L) bf16
    # x_ref: (TB, L, TD)    bf16
    # o_ref: (TB, out_len_p, TD)
    m = m_ref[...]
    for b in range(x_ref.shape[0]):            # TB is static -> fully unrolled
        o_ref[b] = jnp.dot(
            m, x_ref[b],
            preferred_element_type=jnp.float32,
        ).astype(o_ref.dtype)


# ---------------------------------------------------------------------------
# Wrappers
# ---------------------------------------------------------------------------
def _nfl_folded(x_emb, m, out_len_p):
    """D < 128 (or ragged D): fold batch into the lane axis."""
    B, L, D = x_emb.shape
    o_dtype = x_emb.dtype
    o_bytes = jnp.dtype(o_dtype).itemsize
    N = B * D

    tn = _choose_tn(N, L, out_len_p, 2, o_bytes)
    n_p = _round_up(N, tn)

    # (B, L, D) -> (L, B*D), zero-pad lanes to a multiple of TN, cast to bf16.
    x_cols = jnp.transpose(x_emb, (1, 0, 2)).reshape(L, N)
    if n_p != N:
        x_cols = jnp.pad(x_cols, ((0, 0), (0, n_p - N)))
    x_cols = x_cols.astype(jnp.bfloat16)

    out = pl.pallas_call(
        _nfl_folded_kernel,
        out_shape=jax.ShapeDtypeStruct((out_len_p, n_p), o_dtype),
        grid_spec=pltpu.PrefetchScalarGridSpec(
            num_scalar_prefetch=0,
            grid=(n_p // tn,),
            in_specs=[
                # Operator matrix: same block every step -> staged once.
                pl.BlockSpec((out_len_p, L), lambda n: (0, 0)),
                pl.BlockSpec((L, tn), lambda n: (0, n)),
            ],
            out_specs=pl.BlockSpec((out_len_p, tn), lambda n: (0, n)),
        ),
        compiler_params=pltpu.CompilerParams(
            dimension_semantics=("parallel",),
            vmem_limit_bytes=_VMEM_LIMIT_BYTES),
        cost_estimate=pl.CostEstimate(
            flops=2 * out_len_p * L * n_p,
            bytes_accessed=2 * out_len_p * L + 2 * L * n_p
                           + o_bytes * out_len_p * n_p,
            transcendentals=0),
    )(m, x_cols)

    # (out_len_p, B*D) -> (B, out_len_p, D)
    return out[:, :N].reshape(out_len_p, B, D).transpose(1, 0, 2)


def _nfl_batched(x_emb, m, out_len_p):
    """D a multiple of 128: keep channels on the lane axis, block TB batches."""
    B, L, D = x_emb.shape
    o_dtype = x_emb.dtype
    o_bytes = jnp.dtype(o_dtype).itemsize

    td = 256 if D % 256 == 0 else 128
    tb = _choose_tb(B, L, out_len_p, td, 2, o_bytes)

    x_bf = x_emb.astype(jnp.bfloat16)

    out = pl.pallas_call(
        _nfl_batched_kernel,
        out_shape=jax.ShapeDtypeStruct((B, out_len_p, D), o_dtype),
        grid_spec=pltpu.PrefetchScalarGridSpec(
            num_scalar_prefetch=0,
            grid=(B // tb, D // td),
            in_specs=[
                pl.BlockSpec((out_len_p, L), lambda bi, di: (0, 0)),
                pl.BlockSpec((tb, L, td), lambda bi, di: (bi, 0, di)),
            ],
            out_specs=pl.BlockSpec((tb, out_len_p, td),
                                   lambda bi, di: (bi, 0, di)),
        ),
        compiler_params=pltpu.CompilerParams(
            dimension_semantics=("parallel", "parallel"),
            vmem_limit_bytes=_VMEM_LIMIT_BYTES),
        cost_estimate=pl.CostEstimate(
            flops=2 * B * out_len_p * L * D,
            bytes_accessed=2 * out_len_p * L + 2 * B * L * D
                           + o_bytes * B * out_len_p * D,
            transcendentals=0),
    )(m, x_bf)
    return out


def neural_fourier_layer(x_emb, *, seq_len, pred_len):
    """x_emb: (B, L, D) real.  Returns (B, seq_len + pred_len, D)."""
    B, L, D = x_emb.shape
    out_len = seq_len + pred_len
    # Slicing [:freq_num] of an L-point rfft keeps at most L//2+1 bins.
    freq_num = min(seq_len // 2 + 1, L // 2 + 1)
    out_len_p = _round_up(out_len, 16)   # sublane-friendly (bf16 M / f32 out)

    m = _fourier_matrix(L, freq_num, out_len, out_len_p, dtype=jnp.bfloat16)

    if D >= 128 and D % 128 == 0:
        y = _nfl_batched(x_emb, m, out_len_p)
    else:
        y = _nfl_folded(x_emb, m, out_len_p)

    return y[:, :out_len, :]


# ---------------------------------------------------------------------------
# Self-test
# ---------------------------------------------------------------------------
if __name__ == "__main__":
    seq_len, pred_len = 32, 16
    out_len = seq_len + pred_len
    freq_num = seq_len // 2 + 1

    key = jax.random.PRNGKey(0)
    # (B=2, D=8) exercises the folded (batch-into-lanes) path,
    # (B=2, D=128) exercises the multi-batch / lane-tiled path.
    for (B, D) in ((2, 8), (2, 128)):
        key, sub = jax.random.split(key)
        x = jax.random.normal(sub, (B, seq_len, D), dtype=jnp.float32)

        out = neural_fourier_layer(x, seq_len=seq_len, pred_len=pred_len)
        out = jax.block_until_ready(out)

        # Pure-numpy reference (same rfft/irfft conventions as torch.fft).
        x_np = np.asarray(x, dtype=np.float64)
        ref = np.fft.irfft(np.fft.rfft(x_np, axis=1)[:, :freq_num],
                           n=out_len, axis=1)

        assert out.shape == (B, out_len, D), out.shape
        # bf16 operands with f32 accumulation: loosened tolerance vs f64 ref.
        np.testing.assert_allclose(np.asarray(out), ref, rtol=5e-2, atol=5e-2)

    print("KERNEL_OK")
</pallas_src>

<mosaic_0001>
module attributes {stable_mosaic.version = 11 : i64} {
  func.func @_nfl_folded_kernel(%arg0: i32, %arg1: memref<48x32xbf16, #tpu.memory_space<vmem>>, %arg2: memref<32x128xbf16, #tpu.memory_space<vmem>>, %arg3: memref<48x128xf32, #tpu.memory_space<vmem>>) attributes {dimension_semantics = [#tpu.dimension_semantics<parallel>], iteration_bounds = array<i64: 1>, scalar_prefetch = 0 : i64, scratch_operands = 0 : i64, tpu.core_type = #tpu.core_type<tc>, window_params = [{pipeline_mode = #tpu.pipeline_mode<synchronous>, transform_indices = @transform_0, window_bounds = array<i64: 48, 32>}, {transform_indices = @transform_1, window_bounds = array<i64: 32, 128>}, {transform_indices = @transform_2, window_bounds = array<i64: 48, 128>}]} {
    %c0 = arith.constant 0 : index
    %c0_0 = arith.constant 0 : index
    %0 = vector.load %arg1[%c0, %c0_0] : memref<48x32xbf16, #tpu.memory_space<vmem>>, vector<48x32xbf16>
    %c0_1 = arith.constant 0 : index
    %c0_2 = arith.constant 0 : index
    %1 = vector.load %arg2[%c0_1, %c0_2] : memref<32x128xbf16, #tpu.memory_space<vmem>>, vector<32x128xbf16>
    %cst = arith.constant dense<0.000000e+00> : vector<48x128xf32>
    %2 = tpu.matmul %0, %1, %cst {dimension_numbers = #tpu.dot_dimension_numbers<[1], [0], [0], [1], [0, 0, 1, 1], [], []>} : vector<48x32xbf16>, vector<32x128xbf16>, vector<48x128xf32> -> vector<48x128xf32>
    %c0_3 = arith.constant 0 : index
    %c0_4 = arith.constant 0 : index
    %3 = vector.load %arg3[%c0_3, %c0_4] : memref<48x128xf32, #tpu.memory_space<vmem>>, vector<48x128xf32>
    tpu.vector_store %arg3[%c0_3, %c0_4], %2 {strides = array<i32>} : memref<48x128xf32, #tpu.memory_space<vmem>>, vector<48x128xf32>,
    return
  }
  func.func @transform_0(%arg0: i32) -> (i32, i32) {
    %c0_i32 = arith.constant 0 : i32
    %c0_i32_0 = arith.constant 0 : i32
    %c0_i32_1 = arith.constant 0 : i32
    return %c0_i32, %c0_i32_0 : i32, i32
  }
  func.func @transform_1(%arg0: i32) -> (i32, i32) {
    %c0_i32 = arith.constant 0 : i32
    %c0_i32_0 = arith.constant 0 : i32
    return %c0_i32, %arg0 : i32, i32
  }
  func.func @transform_2(%arg0: i32) -> (i32, i32) {
    %c0_i32 = arith.constant 0 : i32
    %c0_i32_0 = arith.constant 0 : i32
    return %c0_i32, %arg0 : i32, i32
  }
}

</mosaic_0001>

<bundles_post_ra>
// kernel: tpu_custom_call.1
= control target key start
LH: loop header
LB: loop body
LE: loop exit
PB: predicated region body
PF: predicated region fallthrough
CT: control target
= control target key end

     0   :  { %v204_v1 = vmov 0.0   ;;  %vm205_vm0 = vmmov 0   ;;  %s242_s0 = inlined_call_operand.vmem [shape: bf16[48,32], index: 0, kind: input, shape index: {}]   ;;  %s243_s1 = inlined_call_operand.vmem [shape: bf16[32,128], index: 1, kind: input, shape index: {}]   ;;  %s244_s2 = inlined_call_operand.hbm [shape: f32[48,128], index: 2, kind: output, shape index: {}]  }
   0x1   :  { %v177_v0 = vld [vmem:[%s243_s1 + $0x8] sm:$0xff]   ;;  %168 = vmatprep.subr.bf16.mxu1 %v204_v1  ;;  %152 = vmatprep.subr.bf16.mxu0 %v204_v1  ;;  %v178_v2 = vld [vmem:[%s243_s1] sm:$0xff]  }
   0x2   :  { %170 = vmatpush3.bf16.msra.mxu1 %v177_v0  ;;  %153 = vmatpush3.bf16.msra.mxu0 %v177_v0  ;;  %v179_v3 = vld [vmem:[%s242_s0 + $0x8] sm:$0xff]   ;;  %v180_v4 = vld [vmem:[%s242_s0] sm:$0xff]  }
   0x3   :  { %169 = vmatprep.subr.bf16.mxu1 %v204_v1  ;;  %154 = vmatprep.subr.bf16.mxu0 %v204_v1 }
   0x4   :  { %160 = vmatprep.mubr.msk.bf16.mxu1 %vm205_vm0, %v204_v1  ;;  %156 = vmatprep.mubr.msk.bf16.mxu0 %vm205_vm0, %v204_v1 }
   0x5   :  { %7 = vsyncpa [#allocation3], 0  ;;  %vm50_vm1 = vcmask 261120   ;;  %v181_v5 = vld [vmem:[%s242_s0 + $0x10] sm:$0xff]   ;;  %s206_s18 = smov [#allocation2]  }
   0x6   :  { %171 = vmatpush3.bf16.msra.mxu1 %v178_v2  ;;  %155 = vmatpush3.bf16.msra.mxu0 %v178_v2  ;;  %s128_s19 = sshll.u32 %s206_s18, 4  ;;  %s129_s19 = int_to_ptr.vmem [resolvable:$true] %s128_s19 }
   0x7   :  { %s182_s0 = scalar_lea.vmem %s129_s19, 768  ;;  %p187_p1 = scmp.lt.s32.totalorder %s129_s19, %s129_s19 }
   0x8   :  { %p183_p0 = scmp.ne.s32.totalorder %s129_s19, %s182_s0  ;;  %p188_p2 = scmp.lt.s32.totalorder %s182_s0, %s182_s0 }
   0x9   :  { %161 = vmatmul.mubr.msk.bf16.vlgmr.msra.gmra.mxu1 %vm50_vm1, %v179_v3  ;;  %157 = vmatmul.mubr.msk.bf16.vlgmr.msra.gmra.mxu0 %vm50_vm1, %v180_v4 }
   0xa   :  { %164 = vmatprep.mubr.msk.bf16.mxu1 %vm205_vm0, %v204_v1  ;;  %p189_p3 = por %p188_p2, %p187_p1 }
   0xc   :  { %p190_p4 = pnand %p189_p3, %p183_p0 }
  0x11   :  { %165 = vmatmul.mubr.msk.bf16.gmra.mxu1 %vm50_vm1, %v181_v5 }
  0xc9   :  { %v102_v6 = vpop.f32.mrf.mxu1  ;;  %v94_v7 = vpop.f32.mrf.mxu0 }
  0xca   :  { %119 = vst [vmem:[#allocation2 + $0x10] sm:$0xff] %v102_v6  ;;  %117 = vst [vmem:[#allocation2] sm:$0xff] %v94_v7 }
  0xcb   :  { %v162_v8 = vpop.f32.mrf.mxu1  ;;  %v158_v9 = vpop.f32.mrf.mxu0 }
  0xcd   :  { %v105_v10 = vpop.f32.mrf.mxu1  ;;  %v97_v11 = vpop.f32.mrf.mxu0 }
  0xce   :  { %120 = vst [vmem:[#allocation2 + $0x18] sm:$0xff] %v105_v10  ;;  %118 = vst [vmem:[#allocation2 + $0x8] sm:$0xff] %v97_v11 }
  0xcf   :  { %v163_v12 = vpop.f32.mrf.mxu1  ;;  %v159_v13 = vpop.f32.mrf.mxu0 }
  0xd1   :  { %v110_v14 = vpop.f32.mrf.mxu1 }
  0xd2   :  { %121 = vst [vmem:[#allocation2 + $0x20] sm:$0xff] %v110_v14 }
  0xd3   :  { %v166_v15 = vpop.f32.mrf.mxu1 }
  0xd5   :  { %v113_v16 = vpop.f32.mrf.mxu1 }
  0xd6   :  { %122 = vst [vmem:[#allocation2 + $0x28] sm:$0xff] %v113_v16 }
  0xd7   :  { %v167_v17 = vpop.f32.mrf.mxu1 }
  0xd8   :  { %193 = shalt.err (!%p190_p4)
}
  0xd9   :  { %s207_s20 = smov 128   ;;  %s208_s21 = smov 8  }
  0xda   :  { %134 = dma.vmem_to_hbm [thread:$0]  %s129_s19, 768, %s244_s2, [#allocation3], %s207_s20, %s207_s20, %s208_s21  }
  0xdb   :  { %202 = dma.done.wait [#allocation3], 768  }
  0xdc   :  { %203 = vsyncadd [#allocation3], 4294966528 }
  0xdd   :  { %138 = vsyncpa [#allocation3], 1 }

</bundles_post_ra>
